<compile_context>
chip_gen: v5e
topology: v5e:2x2
jax: 0.10.0
libtpu: 0.0.40
codegen_flags: <defaults>
</compile_context>

<pallas_src>
import functools

import jax
import jax.numpy as jnp
from jax.experimental import pallas as pl
from jax.experimental.pallas import tpu as pltpu

EPS = 1e-5


def _layernorm_kernel(x_ref, w_ref, b_ref, o_ref, *, inv_c):
    # x_ref: (tile_rows, C) tile of rows; w_ref/b_ref: (1, C) f32 params (resident).
    x = x_ref[...].astype(jnp.float32)
    s1 = jnp.sum(x, axis=-1, keepdims=True)
    s2 = jnp.sum(x * x, axis=-1, keepdims=True)
    mean = s1 * inv_c
    var = jnp.maximum(s2 * inv_c - mean * mean, 0.0)
    inv = jax.lax.rsqrt(var + EPS)
    y = (x - mean) * inv
    y = y * w_ref[...] + b_ref[...]
    o_ref[...] = y.astype(o_ref.dtype)


def _vmem_capacity_bytes():
    try:
        return int(pltpu.get_tpu_info().vmem_capacity_bytes)
    except Exception:
        return 64 << 20  # conservative fallback (v7x per-TensorCore VMEM)


def _round_up(v, m):
    return ((v + m - 1) // m) * m


def _pick_tile_rows(n_rows, c, itemsize):
    """Largest row tile that comfortably fits VMEM, multiple of 8 (16 if possible)."""
    capacity = _vmem_capacity_bytes()
    live_budget = capacity // 2  # headroom for compiler scratch / register spills
    # Per-row cost: double-buffered input + output tiles at input dtype,
    # plus f32 working copies inside the kernel.
    per_row = c * (4 * itemsize + 8)
    t = max(8, live_budget // max(per_row, 1))
    # Keep >= 2 grid steps when possible (megacore sharding on v7x) and don't
    # allocate a block much larger than the array itself.
    t = min(t, max(8, _round_up(pl.cdiv(n_rows, 2), 8)))
    t = min(t, 2048)
    t = max(16, (t // 16) * 16) if t >= 16 else 8
    return int(t)


def _vmem_limit_bytes(tile_rows, c, itemsize):
    capacity = _vmem_capacity_bytes()
    needed = 4 * tile_rows * c * itemsize   # double-buffered in + out tiles
    needed += 4 * tile_rows * c * 4         # f32 intermediates / headroom
    needed += 4 * c * 4 + (2 << 20)         # params + slack
    return int(min(capacity, max(needed, 32 << 20)))


@functools.partial(jax.jit, static_argnames=("tile_rows", "vmem_limit_bytes"))
def _layer_norm_2d(x2, w2, b2, *, tile_rows, vmem_limit_bytes):
    n_rows, c = x2.shape
    kernel = functools.partial(_layernorm_kernel, inv_c=float(1.0 / c))
    return pl.pallas_call(
        kernel,
        out_shape=jax.ShapeDtypeStruct((n_rows, c), x2.dtype),
        grid_spec=pltpu.PrefetchScalarGridSpec(
            num_scalar_prefetch=0,
            grid=(pl.cdiv(n_rows, tile_rows),),
            in_specs=[
                pl.BlockSpec((tile_rows, c), lambda i: (i, 0)),
                pl.BlockSpec((1, c), lambda i: (0, 0)),
                pl.BlockSpec((1, c), lambda i: (0, 0)),
            ],
            out_specs=pl.BlockSpec((tile_rows, c), lambda i: (i, 0)),
        ),
        compiler_params=pltpu.CompilerParams(
            dimension_semantics=("parallel",),
            vmem_limit_bytes=vmem_limit_bytes,
        ),
    )(x2, w2, b2)


def layer_norm(x, weight, bias=None, *, tile_rows=None):
    """LayerNorm over the last axis of x. weight/bias have shape (C,)."""
    orig_shape = x.shape
    c = int(orig_shape[-1])
    rows = 1
    for d in orig_shape[:-1]:
        rows *= int(d)
    x2 = x.reshape(rows, c)

    w2 = weight.astype(jnp.float32).reshape(1, c)
    if bias is not None:
        b2 = bias.astype(jnp.float32).reshape(1, c)
    else:
        b2 = jnp.zeros((1, c), dtype=jnp.float32)

    itemsize = jnp.dtype(x.dtype).itemsize
    if tile_rows is None:
        tile_rows = _pick_tile_rows(rows, c, itemsize)
    vmem_limit = _vmem_limit_bytes(tile_rows, c, itemsize)

    out = _layer_norm_2d(x2, w2, b2, tile_rows=tile_rows,
                         vmem_limit_bytes=vmem_limit)
    return out.reshape(orig_shape)


def _reference_layer_norm(x, weight, bias):
    xf = x.astype(jnp.float32)
    mean = jnp.mean(xf, axis=-1, keepdims=True)
    var = jnp.mean((xf - mean) ** 2, axis=-1, keepdims=True)
    y = (xf - mean) * jax.lax.rsqrt(var + EPS)
    y = y * weight + (bias if bias is not None else 0.0)
    return y.astype(x.dtype)


if __name__ == "__main__":
    key = jax.random.PRNGKey(0)
    B, T, C = 2, 8, 32  # batch, seq, hidden

    # Parameter init matching the nn.Module: weight = ones(ndim), bias = zeros(ndim).
    weight = jnp.ones((C,), dtype=jnp.float32)
    bias = jnp.zeros((C,), dtype=jnp.float32)

    x = jax.random.normal(key, (B, T, C), dtype=jnp.float32)

    out = layer_norm(x, weight, bias)
    out = jax.block_until_ready(out)

    ref = _reference_layer_norm(x, weight, bias)
    assert out.shape == x.shape and out.dtype == x.dtype
    assert jnp.allclose(out, ref, atol=1e-5, rtol=1e-5), "mismatch vs reference"

    # Also exercise the bias=None path (module with bias=False).
    out_nb = jax.block_until_ready(layer_norm(x, weight, None))
    ref_nb = _reference_layer_norm(x, weight, None)
    assert jnp.allclose(out_nb, ref_nb, atol=1e-5, rtol=1e-5), "mismatch (no bias)"

    print("KERNEL_OK")
</pallas_src>

<mosaic_0001>
module attributes {stable_mosaic.version = 11 : i64} {
  func.func @_layernorm_kernel(%arg0: i32, %arg1: memref<8x32xf32, #tpu.memory_space<vmem>>, %arg2: memref<1x32xf32, #tpu.memory_space<vmem>>, %arg3: memref<1x32xf32, #tpu.memory_space<vmem>>, %arg4: memref<8x32xf32, #tpu.memory_space<vmem>>) attributes {dimension_semantics = [#tpu.dimension_semantics<parallel>], iteration_bounds = array<i64: 2>, scalar_prefetch = 0 : i64, scratch_operands = 0 : i64, tpu.core_type = #tpu.core_type<tc>, window_params = [{transform_indices = @transform_0, window_bounds = array<i64: 8, 32>}, {pipeline_mode = #tpu.pipeline_mode<synchronous>, transform_indices = @transform_1, window_bounds = array<i64: 1, 32>}, {pipeline_mode = #tpu.pipeline_mode<synchronous>, transform_indices = @transform_2, window_bounds = array<i64: 1, 32>}, {transform_indices = @transform_3, window_bounds = array<i64: 8, 32>}]} {
    %c0 = arith.constant 0 : index
    %c0_0 = arith.constant 0 : index
    %0 = vector.load %arg1[%c0, %c0_0] : memref<8x32xf32, #tpu.memory_space<vmem>>, vector<8x32xf32>
    %cst = arith.constant dense<0.000000e+00> : vector<8xf32>
    %1 = vector.multi_reduction <add>, %0, %cst [1] : vector<8x32xf32> to vector<8xf32>
    %2 = vector.shape_cast %1 : vector<8xf32> to vector<8x1xf32>
    %3 = arith.mulf %0, %0 : vector<8x32xf32>
    %cst_1 = arith.constant dense<0.000000e+00> : vector<8xf32>
    %4 = vector.multi_reduction <add>, %3, %cst_1 [1] : vector<8x32xf32> to vector<8xf32>
    %5 = vector.shape_cast %4 : vector<8xf32> to vector<8x1xf32>
    %cst_2 = arith.constant 3.125000e-02 : f32
    %6 = vector.broadcast %cst_2 : f32 to vector<8x1xf32>
    %7 = arith.mulf %2, %6 : vector<8x1xf32>
    %cst_3 = arith.constant 3.125000e-02 : f32
    %8 = vector.broadcast %cst_3 : f32 to vector<8x1xf32>
    %9 = arith.mulf %5, %8 : vector<8x1xf32>
    %10 = arith.mulf %7, %7 : vector<8x1xf32>
    %11 = arith.subf %9, %10 : vector<8x1xf32>
    %cst_4 = arith.constant 0.000000e+00 : f32
    %12 = vector.broadcast %cst_4 : f32 to vector<8x1xf32>
    %13 = arith.maximumf %11, %12 : vector<8x1xf32>
    %cst_5 = arith.constant 9.99999974E-6 : f32
    %14 = vector.broadcast %cst_5 : f32 to vector<8x1xf32>
    %15 = arith.addf %13, %14 : vector<8x1xf32>
    %16 = math.rsqrt %15 : vector<8x1xf32>
    %17 = vector.broadcast %7 : vector<8x1xf32> to vector<8x32xf32>
    %18 = arith.subf %0, %17 : vector<8x32xf32>
    %19 = vector.broadcast %16 : vector<8x1xf32> to vector<8x32xf32>
    %20 = arith.mulf %18, %19 : vector<8x32xf32>
    %c0_6 = arith.constant 0 : index
    %c0_7 = arith.constant 0 : index
    %21 = vector.load %arg2[%c0_6, %c0_7] : memref<1x32xf32, #tpu.memory_space<vmem>>, vector<1x32xf32>
    %22 = vector.broadcast %21 : vector<1x32xf32> to vector<8x32xf32>
    %23 = arith.mulf %20, %22 : vector<8x32xf32>
    %c0_8 = arith.constant 0 : index
    %c0_9 = arith.constant 0 : index
    %24 = vector.load %arg3[%c0_8, %c0_9] : memref<1x32xf32, #tpu.memory_space<vmem>>, vector<1x32xf32>
    %25 = vector.broadcast %24 : vector<1x32xf32> to vector<8x32xf32>
    %26 = arith.addf %23, %25 : vector<8x32xf32>
    %c0_10 = arith.constant 0 : index
    %c0_11 = arith.constant 0 : index
    %27 = vector.load %arg4[%c0_10, %c0_11] : memref<8x32xf32, #tpu.memory_space<vmem>>, vector<8x32xf32>
    tpu.vector_store %arg4[%c0_10, %c0_11], %26 {strides = array<i32>} : memref<8x32xf32, #tpu.memory_space<vmem>>, vector<8x32xf32>,
    return
  }
  func.func @transform_0(%arg0: i32) -> (i32, i32) {
    %c0_i32 = arith.constant 0 : i32
    %c0_i32_0 = arith.constant 0 : i32
    return %arg0, %c0_i32 : i32, i32
  }
  func.func @transform_1(%arg0: i32) -> (i32, i32) {
    %c0_i32 = arith.constant 0 : i32
    %c0_i32_0 = arith.constant 0 : i32
    %c0_i32_1 = arith.constant 0 : i32
    return %c0_i32, %c0_i32_0 : i32, i32
  }
  func.func @transform_2(%arg0: i32) -> (i32, i32) {
    %c0_i32 = arith.constant 0 : i32
    %c0_i32_0 = arith.constant 0 : i32
    %c0_i32_1 = arith.constant 0 : i32
    return %c0_i32, %c0_i32_0 : i32, i32
  }
  func.func @transform_3(%arg0: i32) -> (i32, i32) {
    %c0_i32 = arith.constant 0 : i32
    %c0_i32_0 = arith.constant 0 : i32
    return %arg0, %c0_i32 : i32, i32
  }
}

</mosaic_0001>

<bundles_post_ra>
// kernel: _layer_norm_2d.1
= control target key start
LH: loop header
LB: loop body
LE: loop exit
PB: predicated region body
PF: predicated region fallthrough
CT: control target
= control target key end

     0   :  { %8 = vsyncpa [#allocation3], 0  ;;  %s713_s0 = inlined_call_operand.hbm [shape: f32[16,32], index: 0, kind: input, shape index: {}]   ;;  %s714_s1 = inlined_call_operand.hbm [shape: f32[1,32], index: 1, kind: input, shape index: {}]   ;;  %s715_s2 = inlined_call_operand.vmem [shape: f32[1,32], index: 2, kind: input, shape index: {}]   ;;  %s716_s3 = inlined_call_operand.hbm [shape: f32[16,32], index: 3, kind: output, shape index: {}]  }
   0x1   :  { %10 = vsyncpa [#allocation3 + $0x1], 0 }
   0x2   :  { %11 = vsyncpa [#allocation6], 0 }
   0x3   :  { %12 = vsyncpa [#allocation4], 0 }
   0x4   :  { %14 = vsyncpa [#allocation4 + $0x1], 0  ;;  %s565_s12 = smov 0   ;;  %s567_s13 = smov 0  }
   0x5   :  { %s569_s14 = smov 0   ;;  %s571_s15 = smov 0  }
   0x6 LB: > { %s586_s16 = sadd.s32 4294967295, %s542_s15   ;;  %s337_s17 = sadd.s32 4294967294, %s542_s15   ;;  %s542_s15 = sphi %s571_s15, %s726_s15   ;;  %s538_s14 = sphi %s569_s14, %s725_s14   ;;  %s534_s13 = sphi %s567_s13, %s724_s13   ;;  %s530_s12 = sphi %s565_s12, %s723_s12  }
   0x7   : > { %p40_p0 = scmp.ne.s32.totalorder %s534_s13, %s530_s12  ;;  %p41_p1 = scmp.eq.s32.totalorder %s586_s16, 0 }
   0x8   : > { %p106_p2 = scmp.eq.s32.totalorder %s586_s16, 1  ;;  %p112_p3 = scmp.eq.s32.totalorder %s337_s17, 1 }
   0x9   : > { %p595_p4 = por %p41_p1, %p40_p0  ;;  %p338_p5 = scmp.ge.s32.totalorder %s542_s15, 1 }
   0xa   : > { %p600_p6 = por %p112_p3, %p40_p0  ;;  %p119_p7 = scmp.lt.s32.totalorder %s542_s15, 3 }
   0xb   : > { %s131_s22 = sshll.u32 %s714_s1, 4  ;;  %s544_s24 = smov [#allocation5]   ;;  %s132_s22 = int_to_ptr.hbm [resolvable:$true] %s131_s22 }
   0xc   : > { %p608_p8 = pnand %p338_p5, %p119_p7  ;;  %s133_s25 = sshll.u32 %s544_s24, 4  ;;  %s134_s25 = int_to_ptr.vmem [resolvable:$true] %s133_s25 }
   0xd   : > { %s618_s26 = sadd.s32 1, %s542_s15   ;;  %s27_s27 = sadd.s32 1, %s538_s14 }
   0xe   : > { %p359_p10 = pneg %p608_p8  ;;  %s24_s28 = ssub.s32 %s542_s15, %s618_s26 }
   0xf   : > { %p25_p12 = scmp.eq.s32.totalorder %s24_s28, 0  ;;  %p34_p13 = scmp.ne.s32.totalorder %s538_s14, %s534_s13 }
  0x10   : > { %p360_p11 = pnand %p359_p10, %p41_p1  ;;  %p35_p0 = scmp.eq.s32.totalorder %s542_s15, 0 }
  0x11   : > { %s627_s29 = scalar_select %p25_p12, %s538_s14, %s27_s27  }
  0x12   : > { %362 = dma.hbm_to_vmem [thread:$0]  (!%p360_p11), %s132_s22, 16, %s134_s25, [#allocation6]  }
  0x13   : > { %p631_p3 = por %p106_p2, %p34_p13  ;;  %p372_p5 = scmp.lt.s32.totalorder %s542_s15, 2 }
  0x14   : > { %s147_s4 = sand.u32 1, %s538_s14   ;;  %s342_s5 = sshll.u32 %s542_s15, 3 }
  0x15   : > { %p36_p7 = por %p35_p0, %p34_p13  ;;  %s341_s6 = sshll.u32 %s147_s4, 3 }
  0x16   : > { %s155_s9 = scalar_lea.hbm %s713_s0, %s342_s5  ;;  %s151_s11 = scalar_lea.vmem [#allocation2], %s341_s6 }
  0x17   : > { %s157_s10 = sshll.u32 %s155_s9, 4  ;;  %s159_s17 = sshll.u32 %s151_s11, 4  ;;  %s158_s10 = int_to_ptr.hbm [resolvable:$true] %s157_s10  ;;  %s160_s17 = int_to_ptr.vmem [resolvable:$true] %s159_s17 }
  0x18   : > { %p641_p10 = pnand %p372_p5, %p36_p7  ;;  %s148_s21 = scalar_lea.sflag [#allocation3], %s147_s4 }
  0x19   : > { %s442_s22 = sshra.s32 %s158_s10, 4  ;;  %s449_s28 = scalar_lea.hbm %s713_s0, 16  ;;  %s443_s22 = int_to_ptr.hbm [resolvable:$true] %s442_s22 }
  0x1a   : > { %s444_s24 = scalar_lea.hbm %s443_s22, 8  ;;  %p446_p11 = pneg %p641_p10 }
  0x1b   : > { %p445_p2 = scmp.ne.s32.totalorder %s443_s22, %s444_s24  ;;  %p450_p0 = scmp.lt.s32.totalorder %s443_s22, %s713_s0 }
  0x1c   : > { %p451_p5 = scmp.lt.s32.totalorder %s449_s28, %s444_s24 }
  0x1d   : > { %p447_p12 = pnand %p446_p11, %p445_p2 }
  0x1e   : > { %p452_p7 = por %p451_p5, %p450_p0 }
  0x1f   : > { %p448_p13 = pneg %p447_p12 }
  0x21   : > { %p453_p9 = pnand %p452_p7, %p448_p13 }
  0x23   : > { %456 = shalt.err (!%p453_p9)
}
  0x24   : > { %366 = dma.hbm_to_vmem [thread:$0]  (!%p641_p10), %s158_s10, 128, %s160_s17, %s148_s21  }
  0x25   : > { %168 = sbr.rel (%p608_p8) target bundleno = 206 (0xce), region = 32  ;;  %s658_s4 = sand.u32 (!%p608_p8), 1, %s534_s13  }
  0x26   : > { %s344_s7 = sshll.u32 (!%p608_p8), %s658_s4, 3  ;;  %s171_s8 = scalar_lea.sflag (!%p608_p8), [#allocation3], %s658_s4 }
  0x27   : > { %s174_s9 = scalar_lea.vmem (!%p608_p8), [#allocation2], %s344_s7 }
  0x2a   : > { %517 = dma.done.wait (%p595_p4), %s171_s8, 128  }
  0x2b   : > { %519 = vsyncadd (%p595_p4), %s171_s8, 4294967168 }
  0x2c   : > { %521 = dma.done.wait (%p41_p1), [#allocation6], 16  }
  0x2d   : > { %523 = vsyncadd (%p41_p1), [#allocation6], 4294967280  ;;  %vm204_vm0 = vcmask 261120   ;;  %v203_v0 = vld [vmem:[%s174_s9] sm:$0xff]  ;;  %s348_s18 = sshll.u32 %s586_s16, 3  ;;  %s202_s21 = scalar_lea.vmem [#allocation7], %s344_s7 }
  0x2e   : > { %v205_v1 = vsel %vm204_vm0, %v203_v0, 0.0  ;;  %v208_v2 = vmul.f32 %v203_v0, %v203_v0  ;;  %v408_v19 = vld [vmem:[#allocation5] ss:$0 sm:$0xff]  ;;  %s252_s11 = scalar_lea.hbm %s716_s3, %s348_s18  ;;  %v409_v22 = vld [vmem:[%s715_s2] ss:$0 sm:$0xff]  ;;  %s254_s16 = sshll.u32 %s202_s21, 4  ;;  %s255_s16 = int_to_ptr.vmem [resolvable:$true] %s254_s16 }
  0x2f   : > { %206 = vadd.xlane.f32.xlu0 %v205_v1  ;;  %s256_s22 = sshll.u32 %s252_s11, 4  ;;  %s242_s24 = scalar_lea.sflag [#allocation4], %s658_s4  ;;  %s257_s22 = int_to_ptr.hbm [resolvable:$true] %s256_s22 }
  0x30   : > { %v209_v3 = vsel %vm204_vm0, %v208_v2, 0.0  ;;  %s486_s25 = sshra.s32 %s257_s22, 4  ;;  %s492_s6 = scalar_lea.hbm %s716_s3, 16  ;;  %s487_s25 = int_to_ptr.hbm [resolvable:$true] %s486_s25 }
  0x31   : > { %s488_s27 = scalar_lea.hbm %s487_s25, 8  ;;  %p493_p9 = scmp.lt.s32.totalorder %s487_s25, %s716_s3 }
  0x32   : > { %p489_p1 = scmp.ne.s32.totalorder %s487_s25, %s488_s27  ;;  %p494_p10 = scmp.lt.s32.totalorder %s492_s6, %s488_s27 }
  0x34   : > { %p490_p4 = pnand %p489_p1, %p631_p3  ;;  %p495_p2 = por %p494_p10, %p493_p9 }
  0x36   : > { %p491_p8 = pneg %p490_p4 }
  0x37   : > { %210 = vadd.xlane.f32.xlu0 %v209_v3 }
  0x38   : > { %p496_p11 = pnand %p495_p2, %p491_p8 }
  0xa2   : > { %v207_v4 = vpop.xlane.xlu0 %206 }
  0xa3   : > { %v212_v5 = vmul.f32 0.03125, %v207_v4 }
  0xa5   : > { %v214_v7 = vmul.f32 %v212_v5, %v212_v5  ;;  %v228_v18 = vsub.f32 %v203_v0, %v212_v5 }
  0xaa   : > { %v211_v6 = vpop.xlane.xlu0 %210 }
  0xab   : > { %v213_v8 = vmul.f32 0.03125, %v211_v6 }
  0xad   : > { %v215_v9 = vsub.f32 %v213_v8, %v214_v7 }
  0xaf   : > { %v216_v10 = vmax.f32 %v215_v9, 0.0 }
  0xb1   : > { %v217_v11 = vadd.f32 1e-05, %v216_v10 }
  0xb3   : > { %410 = vrsqrt.f32 %v217_v11  ;;  %vm224_vm2 = vweird.f32 %v217_v11 }
  0xb9   : > { %v411_v12 = vpop.eup %410 }
  0xba   : > { %v219_v13 = vmul.f32 %v411_v12, %v217_v11  ;;  %vm225_vm1 = vweird.f32 %v411_v12 }
  0xbb   : > { %vm226_vm3 = vmor %vm224_vm2, %vm225_vm1 }
  0xbc   : > { %v220_v14 = vmul.f32 %v411_v12, %v219_v13 }
  0xbe   : > { %v221_v15 = vmul.f32 0.5, %v220_v14 }
  0xc0   : > { %v222_v16 = vsub.f32 1.5, %v221_v15 }
  0xc2   : > { %v223_v17 = vmul.f32 %v411_v12, %v222_v16 }
  0xc4   : > { %v227_v20 = vsel %vm226_vm3, %v411_v12, %v223_v17 }
  0xc5   : > { %v229_v21 = vmul.f32 %v228_v18, %v227_v20 }
  0xc7   : > { %v234_v23 = vmul.f32 %v408_v19, %v229_v21 }
  0xc9   : > { %v239_v24 = vadd.f32 %v409_v22, %v234_v23 }
  0xcb   : > { %240 = vst.msk [vmem:[%s202_s21] sm:$0xff] %vm204_vm0, %v239_v24 }
  0xcc   : > { %499 = shalt.err (!%p496_p11)
}
  0xcd   : > { %357 = dma.vmem_to_hbm [thread:$0]  (%p631_p3), %s255_s16, 128, %s257_s22, %s242_s24  }
  0xce PF: > { %s268_s4 = sand.u32 1, %s530_s12   ;;  %p722_p12 = scmp.ge.s32.totalorder %s542_s15, 2 }
  0xcf   : > { %s269_s9 = scalar_lea.sflag [#allocation4], %s268_s4 }
  0xd0   : > { %p368_p13 = pnand %p722_p12, %p600_p6 }
  0xd2   : > { %p369_p0 = pneg %p368_p13 }
  0xd4   : > { %525 = dma.done.wait (%p369_p0), %s269_s9, 128  }
  0xd5   : > { %527 = vsyncadd (%p369_p0), %s269_s9, 4294967168  ;;  %p17_p5 = scmp.ge.s32.totalorder %s618_s26, 4   ;;  %s723_s12 = smov %s534_s13 }
  0xd6   : > { %s724_s13 = smov %s538_s14  ;;  %s725_s14 = smov %s627_s29 }
  0xd7   : > { %s726_s15 = smov %s618_s26  ;;  %19 = sbr.rel (!%p17_p5) target bundleno = 6 (0x6), region = 81 }
  0xdc   :  { %275 = vsyncpa [#allocation3], 1 }
  0xdd   :  { %277 = vsyncpa [#allocation3 + $0x1], 1 }
  0xde   :  { %278 = vsyncpa [#allocation6], 1 }
  0xdf   :  { %279 = vsyncpa [#allocation4], 1 }
  0xe0   :  { %281 = vsyncpa [#allocation4 + $0x1], 1 }

</bundles_post_ra>
